<compile_context>
chip_gen: v7x
topology: tpu7x:2x2x1
jax: 0.10.0
libtpu: 0.0.40
codegen_flags: <defaults>
</compile_context>

<pallas_src>
import functools

import jax
import jax.numpy as jnp
from jax import lax
from jax.experimental import pallas as pl
from jax.experimental.pallas import tpu as pltpu


def _round_up(x: int, m: int) -> int:
    return ((x + m - 1) // m) * m


def _st_inner_product_kernel(src_ref, tgt_ref, out_ref):
    """One (tm, tn) tile of adj = sigmoid(z_source @ z_target.T).

    src_ref: (tm, H) tile of source embeddings (bf16)
    tgt_ref: (tn, H) tile of target embeddings (bf16)
    out_ref: (tm, tn) tile of the output adjacency
    """
    # NT matmul: contract the last axis of both operands — no .T / XLU transpose,
    # f32 accumulation on the MXU.
    scores = lax.dot_general(
        src_ref[...],
        tgt_ref[...],
        dimension_numbers=(((1,), (1,)), ((), ())),
        preferred_element_type=jnp.float32,
    )
    out_ref[...] = jax.nn.sigmoid(scores).astype(out_ref.dtype)


@functools.partial(
    jax.jit,
    static_argnames=("dropout", "training", "tm", "tn", "out_dtype", "compute_dtype"),
)
def source_target_inner_product_decoder(
    z,
    sampled_nodes,
    *,
    dropout=0.0,
    training=False,
    rng=None,
    tm=512,
    tn=512,
    out_dtype=jnp.float32,       # writeback-bound: pass jnp.bfloat16 to halve output HBM traffic
    compute_dtype=jnp.bfloat16,  # bf16 operands, f32 accumulation (MXU-native on v5e/v6e/v7x)
):
    """JAX/Pallas equivalent of SourceTargetInnerProductDecoder.forward."""
    # --- glue: dropout (F.dropout semantics: no-op unless training) ---
    if training and dropout > 0.0:
        if rng is None:
            raise ValueError("rng must be provided when training with dropout > 0")
        keep = jax.random.bernoulli(rng, 1.0 - dropout, z.shape)
        z = jnp.where(keep, z / (1.0 - dropout), 0.0).astype(z.dtype)

    # --- glue: row gather (data-dependent; stays in XLA, fused with the cast below) ---
    zg = z[sampled_nodes]                      # (M, D)
    M, D = zg.shape
    assert D % 2 == 0, "embedding dim must be even (torch.mm would also fail for odd D)"
    H = D // 2

    # --- tile / pad geometry ---
    # Square tiles, clamped for small M, always a lane-dense multiple of 128.
    tile = min(max(tm, tn), _round_up(M, 128))
    tm = tn = tile
    M_pad = _round_up(M, tile)

    zg = zg.astype(compute_dtype)
    if M_pad != M:
        zg = jnp.pad(zg, ((0, M_pad - M), (0, 0)))  # zero rows -> sliced off below

    # --- source/target half selection ---
    if H % 128 == 0:
        # Select the halves directly via BlockSpec column-block offsets on the same array
        # (column block 0 -> cols [0:H], column block 1 -> cols [H:2H]); avoids materializing
        # two sliced (M, H) copies in HBM.
        src_spec = pl.BlockSpec((tm, H), lambda i, j: (i, 0))
        tgt_spec = pl.BlockSpec((tn, H), lambda i, j: (j, 1))
        operands = (zg, zg)
    else:
        # Fallback: H is not lane-aligned, so a column-blocked BlockSpec is not legal;
        # slice in the wrapper (block shape then equals the full minor dim, which is allowed).
        z_source = zg[:, :H]
        z_target = zg[:, H:D]
        src_spec = pl.BlockSpec((tm, H), lambda i, j: (i, 0))
        tgt_spec = pl.BlockSpec((tn, H), lambda i, j: (j, 0))
        operands = (z_source, z_target)

    # --- hot path: 2-D tiled NT matmul + fused sigmoid ---
    grid = (M_pad // tm, M_pad // tn)   # j innermost: src tile stays resident across j
    adj_pad = pl.pallas_call(
        _st_inner_product_kernel,
        out_shape=jax.ShapeDtypeStruct((M_pad, M_pad), out_dtype),
        grid_spec=pltpu.PrefetchScalarGridSpec(
            num_scalar_prefetch=0,
            grid=grid,
            in_specs=[src_spec, tgt_spec],
            out_specs=pl.BlockSpec((tm, tn), lambda i, j: (i, j)),
        ),
        compiler_params=pltpu.CompilerParams(
            # Both axes are independent -> megacore sharding on v7x's 2 TensorCores.
            dimension_semantics=("parallel", "parallel"),
            # Headroom-safe on v7x (64 MiB physical); 512-tiles use only a few MiB.
            vmem_limit_bytes=48 * 1024 * 1024,
        ),
    )(*operands)

    # Drop padded rows/cols.
    return adj_pad[:M, :M]


def _reference(z, sampled_nodes, compute_dtype=jnp.bfloat16):
    zs = z[sampled_nodes].astype(compute_dtype)
    H = zs.shape[1] // 2
    return jax.nn.sigmoid(
        jnp.dot(zs[:, :H], zs[:, H:].T, preferred_element_type=jnp.float32)
    )


if __name__ == "__main__":
    key = jax.random.PRNGKey(0)
    k_z, k_idx, k_z2, k_idx2, k_z3, k_idx3 = jax.random.split(key, 6)

    # ---- Config 1: H = 128 (lane-aligned) -> column-offset BlockSpec path, ragged M ----
    N, D, M = 64, 256, 16
    z = jax.random.normal(k_z, (N, D), dtype=jnp.float32)
    sampled_nodes = jax.random.permutation(k_idx, N)[:M]

    adj = source_target_inner_product_decoder(z, sampled_nodes, dropout=0.5, training=False)
    adj = jax.block_until_ready(adj)
    ref = _reference(z, sampled_nodes)
    assert adj.shape == (M, M)
    assert jnp.allclose(adj, ref, atol=2e-3, rtol=2e-3)

    # ---- Config 2: H = 16 (not lane-aligned) -> wrapper-slice fallback, ragged M ----
    N2, D2, M2 = 48, 32, 10
    z2 = jax.random.normal(k_z2, (N2, D2), dtype=jnp.float32)
    sampled2 = jax.random.permutation(k_idx2, N2)[:M2]

    adj2 = jax.block_until_ready(source_target_inner_product_decoder(z2, sampled2))
    ref2 = _reference(z2, sampled2)
    assert adj2.shape == (M2, M2)
    assert jnp.allclose(adj2, ref2, atol=2e-3, rtol=2e-3)

    # ---- Config 3: small tiles forced -> multi-tile 2x2 grid with row/col padding ----
    N3, D3, M3 = 256, 256, 200
    z3 = jax.random.normal(k_z3, (N3, D3), dtype=jnp.float32)
    sampled3 = jax.random.permutation(k_idx3, N3)[:M3]

    adj3 = jax.block_until_ready(
        source_target_inner_product_decoder(z3, sampled3, tm=128, tn=128)
    )
    ref3 = _reference(z3, sampled3)
    assert adj3.shape == (M3, M3)
    assert jnp.allclose(adj3, ref3, atol=2e-3, rtol=2e-3)

    print("KERNEL_OK")
</pallas_src>

<mosaic_0001>
module attributes {stable_mosaic.version = 11 : i64} {
  func.func @_st_inner_product_kernel(%arg0: i32, %arg1: i32, %arg2: memref<128x128xbf16, #tpu.memory_space<vmem>>, %arg3: memref<128x128xbf16, #tpu.memory_space<vmem>>, %arg4: memref<128x128xf32, #tpu.memory_space<vmem>>) attributes {dimension_semantics = [#tpu.dimension_semantics<parallel>, #tpu.dimension_semantics<parallel>], iteration_bounds = array<i64: 1, 1>, scalar_prefetch = 0 : i64, scratch_operands = 0 : i64, tpu.core_type = #tpu.core_type<tc>, window_params = [{transform_indices = @transform_0, window_bounds = array<i64: 128, 128>}, {transform_indices = @transform_1, window_bounds = array<i64: 128, 128>}, {transform_indices = @transform_2, window_bounds = array<i64: 128, 128>}]} {
    %c0 = arith.constant 0 : index
    %c0_0 = arith.constant 0 : index
    %0 = vector.load %arg2[%c0, %c0_0] : memref<128x128xbf16, #tpu.memory_space<vmem>>, vector<128x128xbf16>
    %c0_1 = arith.constant 0 : index
    %c0_2 = arith.constant 0 : index
    %1 = vector.load %arg3[%c0_1, %c0_2] : memref<128x128xbf16, #tpu.memory_space<vmem>>, vector<128x128xbf16>
    %cst = arith.constant dense<0.000000e+00> : vector<128x128xf32>
    %2 = tpu.matmul %0, %1, %cst {dimension_numbers = #tpu.dot_dimension_numbers<[1], [1], [0], [0], [0, 0, 1, 0], [], []>} : vector<128x128xbf16>, vector<128x128xbf16>, vector<128x128xf32> -> vector<128x128xf32>
    %3 = arith.negf %2 : vector<128x128xf32>
    %4 = math.exp %3 : vector<128x128xf32>
    %cst_3 = arith.constant 1.000000e+00 : f32
    %5 = vector.broadcast %cst_3 : f32 to vector<128x128xf32>
    %6 = arith.addf %5, %4 : vector<128x128xf32>
    %7 = arith.divf %5, %6 : vector<128x128xf32>
    %c0_4 = arith.constant 0 : index
    %c0_5 = arith.constant 0 : index
    %8 = vector.load %arg4[%c0_4, %c0_5] : memref<128x128xf32, #tpu.memory_space<vmem>>, vector<128x128xf32>
    tpu.vector_store %arg4[%c0_4, %c0_5], %7 {strides = array<i32>} : memref<128x128xf32, #tpu.memory_space<vmem>>, vector<128x128xf32>,
    return
  }
  func.func @transform_0(%arg0: i32, %arg1: i32) -> (i32, i32) {
    %c0_i32 = arith.constant 0 : i32
    %c0_i32_0 = arith.constant 0 : i32
    return %arg0, %c0_i32 : i32, i32
  }
  func.func @transform_1(%arg0: i32, %arg1: i32) -> (i32, i32) {
    %c1_i32 = arith.constant 1 : i32
    %c0_i32 = arith.constant 0 : i32
    return %arg1, %c1_i32 : i32, i32
  }
  func.func @transform_2(%arg0: i32, %arg1: i32) -> (i32, i32) {
    %c0_i32 = arith.constant 0 : i32
    return %arg0, %arg1 : i32, i32
  }
}

</mosaic_0001>

<bundles_post_ra>
// kernel: source_target_inner_product_decoder.1
= control target key start
LH: loop header
LB: loop body
LE: loop exit
PB: predicated region body
PF: predicated region fallthrough
CT: control target
= control target key end

     0   :  { %s915_s0 = inlined_call_operand.vmem [shape: bf16[128,256], index: 0, kind: input, shape index: {}, may-alias: {0,1}]   ;;  %s916_s1 = inlined_call_operand.vmem [shape: bf16[128,256], index: 1, kind: input, shape index: {}, may-alias: {0,1}]   ;;  %s917_s2 = inlined_call_operand.vmem [shape: f32[128,128], index: 2, kind: output, shape index: {}]  }
   0x1   :  { %v564_v0 = vld [vmem:[%s916_s1 + $0x4] sm:$0xf]  ;;  %v565_v1 = vld [vmem:[%s916_s1 + $0xc] sm:$0xf]  ;;  %v566_v2 = vld [vmem:[%s916_s1 + $0x14] sm:$0xf] }
   0x2   :  { %127 = vst [vmem:[#allocation3] sm:$0xf] %v564_v0  ;;  %129 = vst [vmem:[#allocation3 + $0x4] sm:$0xf] %v565_v1  ;;  %v567_v3 = vld [vmem:[%s916_s1 + $0x1c] sm:$0xf] }
   0x3   :  { %131 = vst [vmem:[#allocation3 + $0x8] sm:$0xf] %v566_v2  ;;  %v568_v4 = vld [vmem:[%s916_s1 + $0x24] sm:$0xf]  ;;  %v569_v5 = vld [vmem:[%s916_s1 + $0x2c] sm:$0xf] }
   0x4   :  { %133 = vst [vmem:[#allocation3 + $0xc] sm:$0xf] %v567_v3  ;;  %135 = vst [vmem:[#allocation3 + $0x10] sm:$0xf] %v568_v4  ;;  %v570_v6 = vld [vmem:[%s916_s1 + $0x34] sm:$0xf] }
   0x5   :  { %137 = vst [vmem:[#allocation3 + $0x14] sm:$0xf] %v569_v5  ;;  %v571_v7 = vld [vmem:[%s916_s1 + $0x3c] sm:$0xf]  ;;  %v572_v8 = vld [vmem:[%s916_s1 + $0x44] sm:$0xf] }
   0x6   :  { %139 = vst [vmem:[#allocation3 + $0x18] sm:$0xf] %v570_v6  ;;  %141 = vst [vmem:[#allocation3 + $0x1c] sm:$0xf] %v571_v7  ;;  %v573_v9 = vld [vmem:[%s916_s1 + $0x4c] sm:$0xf] }
   0x7   :  { %143 = vst [vmem:[#allocation3 + $0x20] sm:$0xf] %v572_v8  ;;  %v574_v10 = vld [vmem:[%s916_s1 + $0x54] sm:$0xf]  ;;  %v575_v11 = vld [vmem:[%s916_s1 + $0x5c] sm:$0xf] }
   0x8   :  { %145 = vst [vmem:[#allocation3 + $0x24] sm:$0xf] %v573_v9  ;;  %147 = vst [vmem:[#allocation3 + $0x28] sm:$0xf] %v574_v10  ;;  %v576_v12 = vld [vmem:[%s916_s1 + $0x64] sm:$0xf] }
   0x9   :  { %149 = vst [vmem:[#allocation3 + $0x2c] sm:$0xf] %v575_v11  ;;  %v577_v13 = vld [vmem:[%s916_s1 + $0x6c] sm:$0xf]  ;;  %v578_v14 = vld [vmem:[%s916_s1 + $0x74] sm:$0xf] }
   0xa   :  { %151 = vst [vmem:[#allocation3 + $0x30] sm:$0xf] %v576_v12  ;;  %153 = vst [vmem:[#allocation3 + $0x34] sm:$0xf] %v577_v13  ;;  %v579_v15 = vld [vmem:[%s916_s1 + $0x7c] sm:$0xf] }
   0xb   :  { %155 = vst [vmem:[#allocation3 + $0x38] sm:$0xf] %v578_v14  ;;  %v24_v16 = vld [vmem:[%s915_s0] sm:$0xf]  ;;  %v26_v17 = vld [vmem:[%s915_s0 + $0x8] sm:$0xf] }
   0xc   :  { %157 = vst [vmem:[#allocation3 + $0x3c] sm:$0xf] %v579_v15  ;;  %25 = vst [vmem:[#allocation2] sm:$0xf] %v24_v16  ;;  %v40_v18 = vld [vmem:[%s915_s0 + $0x40] sm:$0xf] }
   0xd   :  { %27 = vst [vmem:[#allocation2 + $0x4] sm:$0xf] %v26_v17  ;;  %v42_v19 = vld [vmem:[%s915_s0 + $0x48] sm:$0xf]  ;;  %v28_v20 = vld [vmem:[%s915_s0 + $0x10] sm:$0xf] }
   0xe   :  { %41 = vst [vmem:[#allocation2 + $0x20] sm:$0xf] %v40_v18  ;;  %43 = vst [vmem:[#allocation2 + $0x24] sm:$0xf] %v42_v19  ;;  %v30_v21 = vld [vmem:[%s915_s0 + $0x18] sm:$0xf] }
   0xf   :  { %29 = vst [vmem:[#allocation2 + $0x8] sm:$0xf] %v28_v20  ;;  %v44_v22 = vld [vmem:[%s915_s0 + $0x50] sm:$0xf]  ;;  %v46_v23 = vld [vmem:[%s915_s0 + $0x58] sm:$0xf] }
  0x10   :  { %v676_v24 = vld [vmem:[#allocation3] sm:$0xff]   ;;  %31 = vst [vmem:[#allocation2 + $0xc] sm:$0xf] %v30_v21  ;;  %45 = vst [vmem:[#allocation2 + $0x28] sm:$0xf] %v44_v22  ;;  %v677_v25 = vld [vmem:[#allocation3 + $0x8] sm:$0xff]  }
  0x11   :  { %47 = vst [vmem:[#allocation2 + $0x2c] sm:$0xf] %v46_v23  ;;  %628 = vmatprep.subr.bf16.mxu0 %v676_v24  ;;  %660 = vmatprep.subr.bf16.mxu1 %v676_v24  ;;  %v678_v26 = vld [vmem:[#allocation3 + $0x10] sm:$0xff]   ;;  %v32_v29 = vld [vmem:[%s915_s0 + $0x20] sm:$0xf]  ;;  %v679_v37 = vld [vmem:[#allocation3 + $0x18] sm:$0xff]  }
  0x12   :  { %629 = vmatpush3.bf16.xpose.msra.mxu0 %v676_v24  ;;  %668 = vmatpush3.bf16.xpose.msra.mxu1 %v676_v24  ;;  %v34_v30 = vld [vmem:[%s915_s0 + $0x28] sm:$0xf]  ;;  %v48_v31 = vld [vmem:[%s915_s0 + $0x60] sm:$0xf]  ;;  %33 = vst [vmem:[#allocation2 + $0x10] sm:$0xf] %v32_v29 }
  0x13   :  { %630 = vmatprep.subr.bf16.mxu0 %v677_v25  ;;  %661 = vmatprep.subr.bf16.mxu1 %v677_v25  ;;  %35 = vst [vmem:[#allocation2 + $0x14] sm:$0xf] %v34_v30  ;;  %49 = vst [vmem:[#allocation2 + $0x30] sm:$0xf] %v48_v31  ;;  %v50_v32 = vld [vmem:[%s915_s0 + $0x68] sm:$0xf] }
  0x14   :  { %v684_v27 = vld [vmem:[#allocation2] sm:$0xff]   ;;  %v36_v33 = vld [vmem:[%s915_s0 + $0x30] sm:$0xf]  ;;  %v38_v34 = vld [vmem:[%s915_s0 + $0x38] sm:$0xf] }
  0x15   :  { %v685_v28 = vld [vmem:[#allocation2 + $0x20] sm:$0xff]   ;;  %644 = vmatprep.mubr.bf16.mxu0 %v684_v27  ;;  %51 = vst [vmem:[#allocation2 + $0x34] sm:$0xf] %v50_v32  ;;  %37 = vst [vmem:[#allocation2 + $0x18] sm:$0xf] %v36_v33  ;;  %v681_v39 = vld [vmem:[#allocation3 + $0x28] sm:$0xff]  }
  0x16   :  { %652 = vmatprep.mubr.bf16.mxu1 %v685_v28  ;;  %39 = vst [vmem:[#allocation2 + $0x1c] sm:$0xf] %v38_v34  ;;  %v52_v35 = vld [vmem:[%s915_s0 + $0x70] sm:$0xf]  ;;  %v54_v36 = vld [vmem:[%s915_s0 + $0x78] sm:$0xf] }
  0x17   :  { %53 = vst [vmem:[#allocation2 + $0x38] sm:$0xf] %v52_v35  ;;  %55 = vst [vmem:[#allocation2 + $0x3c] sm:$0xf] %v54_v36  ;;  %v680_v38 = vld [vmem:[#allocation3 + $0x20] sm:$0xff]   ;;  %v682_v40 = vld [vmem:[#allocation3 + $0x30] sm:$0xff]  }
  0x18   :  { %v683_v41 = vld [vmem:[#allocation3 + $0x38] sm:$0xff]   ;;  %v686_v42 = vld [vmem:[#allocation2 + $0x8] sm:$0xff]  }
  0x19   :  { %v687_v43 = vld [vmem:[#allocation2 + $0x28] sm:$0xff]  }
  0x1a   :  { %631 = vmatpush3.bf16.xpose.msra.mxu0 %v677_v25  ;;  %669 = vmatpush3.bf16.xpose.msra.mxu1 %v677_v25  ;;  %v688_v44 = vld [vmem:[#allocation2 + $0x10] sm:$0xff]  }
  0x1b   :  { %632 = vmatprep.subr.bf16.mxu0 %v678_v26  ;;  %662 = vmatprep.subr.bf16.mxu1 %v678_v26 }
  0x1c   :  { %v689_v45 = vld [vmem:[#allocation2 + $0x30] sm:$0xff]  }
  0x1d   :  { %v690_v46 = vld [vmem:[#allocation2 + $0x18] sm:$0xff]  }
  0x1e   :  { %v691_v47 = vld [vmem:[#allocation2 + $0x38] sm:$0xff]  }
  0x22   :  { %633 = vmatpush3.bf16.xpose.msra.mxu0 %v678_v26  ;;  %670 = vmatpush3.bf16.xpose.msra.mxu1 %v678_v26 }
  0x23   :  { %634 = vmatprep.subr.bf16.mxu0 %v679_v37  ;;  %663 = vmatprep.subr.bf16.mxu1 %v679_v37 }
  0x2a   :  { %635 = vmatpush3.bf16.xpose.msra.mxu0 %v679_v37  ;;  %671 = vmatpush3.bf16.xpose.msra.mxu1 %v679_v37 }
  0x2b   :  { %636 = vmatprep.subr.bf16.mxu0 %v680_v38  ;;  %664 = vmatprep.subr.bf16.mxu1 %v680_v38 }
  0x32   :  { %637 = vmatpush3.bf16.xpose.msra.mxu0 %v680_v38  ;;  %672 = vmatpush3.bf16.xpose.msra.mxu1 %v680_v38 }
  0x33   :  { %638 = vmatprep.subr.bf16.mxu0 %v681_v39  ;;  %665 = vmatprep.subr.bf16.mxu1 %v681_v39 }
  0x3a   :  { %639 = vmatpush3.bf16.xpose.msra.mxu0 %v681_v39  ;;  %673 = vmatpush3.bf16.xpose.msra.mxu1 %v681_v39 }
  0x3b   :  { %640 = vmatprep.subr.bf16.mxu0 %v682_v40  ;;  %666 = vmatprep.subr.bf16.mxu1 %v682_v40 }
  0x42   :  { %641 = vmatpush3.bf16.xpose.msra.mxu0 %v682_v40  ;;  %674 = vmatpush3.bf16.xpose.msra.mxu1 %v682_v40 }
  0x43   :  { %642 = vmatprep.subr.bf16.mxu0 %v683_v41  ;;  %667 = vmatprep.subr.bf16.mxu1 %v683_v41 }
  0x4a   :  { %643 = vmatpush3.bf16.xpose.msra.mxu0 %v683_v41  ;;  %675 = vmatpush3.bf16.xpose.msra.mxu1 %v683_v41 }
  0x51   :  { %645 = vmatmul.mubr.bf16.vlgmr.msra.gmra.mrb[0].mxu0 %v686_v42  ;;  %653 = vmatmul.mubr.bf16.vlgmr.msra.gmra.mrb[0].mxu1 %v687_v43 }
  0x52   :  { %648 = vmatprep.mubr.bf16.mxu0 %v688_v44  ;;  %656 = vmatprep.mubr.bf16.mxu1 %v689_v45 }
  0x59   :  { %649 = vmatmul.mubr.bf16.gmra.mrb[4].mxu0 %v690_v46  ;;  %657 = vmatmul.mubr.bf16.gmra.mrb[4].mxu1 %v691_v47 }
 0x124   :  { %v646_v48 = vpop.f32.mrb[0].mxu0  ;;  %v654_v49 = vpop.f32.mrb[0].mxu1 }
 0x125   :  { %v598_v50 = vmul.f32 -1.442695, %v646_v48  ;;  %v606_v51 = vmul.f32 -1.442695, %v654_v49  ;;  %v377_v52 = vpop.f32.mrb[1].mxu0  ;;  %v409_v53 = vpop.f32.mrb[1].mxu1 }
 0x126   :  { %v596_v54 = vmul.f32 -1.442695, %v377_v52  ;;  %v604_v55 = vmul.f32 -1.442695, %v409_v53  ;;  %v647_v56 = vpop.f32.mrb[2].mxu0  ;;  %v655_v57 = vpop.f32.mrb[2].mxu1 }
 0x127   :  { %692 = vpow2.f32 %v598_v50  ;;  %v599_v58 = vmul.f32 -1.442695, %v647_v56  ;;  %v380_v59 = vpop.f32.mrb[3].mxu0  ;;  %v412_v60 = vpop.f32.mrb[3].mxu1  ;;  %v607_v61 = vmul.f32 -1.442695, %v655_v57 }
 0x128   :  { %694 = vpow2.f32 %v606_v51  ;;  %v597_v62 = vmul.f32 -1.442695, %v380_v59  ;;  %v605_v63 = vmul.f32 -1.442695, %v412_v60 }
 0x129   :  { %696 = vpow2.f32 %v596_v54 }
 0x12a   :  { %698 = vpow2.f32 %v604_v55 }
 0x12b   :  { %700 = vpow2.f32 %v599_v58 }
 0x12c   :  { %702 = vpow2.f32 %v607_v61  ;;  %v650_v0 = vpop.f32.mrb[4].mxu0  ;;  %v658_v1 = vpop.f32.mrb[4].mxu1 }
 0x12d   :  { %704 = vpow2.f32 %v597_v62  ;;  %v602_v2 = vmul.f32 -1.442695, %v650_v0  ;;  %v610_v3 = vmul.f32 -1.442695, %v658_v1  ;;  %v393_v4 = vpop.f32.mrb[5].mxu0  ;;  %v425_v5 = vpop.f32.mrb[5].mxu1 }
 0x12e   :  { %706 = vpow2.f32 %v605_v63  ;;  %v600_v6 = vmul.f32 -1.442695, %v393_v4  ;;  %v608_v7 = vmul.f32 -1.442695, %v425_v5  ;;  %v651_v8 = vpop.f32.mrb[6].mxu0  ;;  %v659_v9 = vpop.f32.mrb[6].mxu1 }
 0x12f   :  { %708 = vpow2.f32 %v602_v2  ;;  %v603_v10 = vmul.f32 -1.442695, %v651_v8  ;;  %v396_v11 = vpop.f32.mrb[7].mxu0  ;;  %v428_v12 = vpop.f32.mrb[7].mxu1  ;;  %v611_v38 = vmul.f32 -1.442695, %v659_v9 }
 0x130   :  { %710 = vpow2.f32 %v610_v3  ;;  %v601_v41 = vmul.f32 -1.442695, %v396_v11  ;;  %v609_v43 = vmul.f32 -1.442695, %v428_v12 }
 0x131   :  { %v693_v13 = vpop.eup %692  ;;  %712 = vpow2.f32 %v600_v6 }
 0x132   :  { %v695_v14 = vpop.eup %694  ;;  %v490_v15 = vadd.f32 1.0, %v693_v13  ;;  %714 = vpow2.f32 %v608_v7 }
 0x133   :  { %v697_v16 = vpop.eup %696  ;;  %v498_v17 = vadd.f32 1.0, %v695_v14  ;;  %716 = vpow2.f32 %v603_v10 }
 0x134   :  { %v699_v18 = vpop.eup %698  ;;  %718 = vrcp.f32 %v490_v15  ;;  %v488_v19 = vadd.f32 1.0, %v697_v16 }
 0x135   :  { %v701_v20 = vpop.eup %700  ;;  %720 = vrcp.f32 %v498_v17  ;;  %v496_v21 = vadd.f32 1.0, %v699_v18 }
 0x136   :  { %v703_v22 = vpop.eup %702  ;;  %722 = vrcp.f32 %v488_v19  ;;  %v491_v23 = vadd.f32 1.0, %v701_v20 }
 0x137   :  { %v705_v24 = vpop.eup %704  ;;  %724 = vrcp.f32 %v496_v21  ;;  %v499_v25 = vadd.f32 1.0, %v703_v22 }
 0x138   :  { %v707_v26 = vpop.eup %706  ;;  %726 = vrcp.f32 %v491_v23  ;;  %v489_v27 = vadd.f32 1.0, %v705_v24 }
 0x139   :  { %v709_v28 = vpop.eup %708  ;;  %728 = vrcp.f32 %v499_v25  ;;  %v497_v29 = vadd.f32 1.0, %v707_v26 }
 0x13a   :  { %v711_v30 = vpop.eup %710  ;;  %730 = vrcp.f32 %v489_v27  ;;  %v494_v31 = vadd.f32 1.0, %v709_v28 }
 0x13b   :  { %v713_v32 = vpop.eup %712  ;;  %732 = vrcp.f32 %v497_v29  ;;  %v502_v33 = vadd.f32 1.0, %v711_v30 }
 0x13c   :  { %v715_v34 = vpop.eup %714  ;;  %734 = vrcp.f32 %v494_v31  ;;  %v492_v35 = vadd.f32 1.0, %v713_v32 }
 0x13d   :  { %v717_v36 = vpop.eup %716  ;;  %736 = vrcp.f32 %v502_v33  ;;  %v500_v37 = vadd.f32 1.0, %v715_v34 }
 0x13e   :  { %v719_v39 = vpop.eup %718  ;;  %738 = vrcp.f32 %v492_v35  ;;  %v495_v40 = vadd.f32 1.0, %v717_v36 }
 0x13f   :  { %v721_v42 = vpop.eup %720  ;;  %538 = vst [vmem:[%s917_s2 + $0x10] sm:$0xff] %v719_v39  ;;  %740 = vrcp.f32 %v500_v37 }
 0x140   :  { %v723_v44 = vpop.eup %722  ;;  %546 = vst [vmem:[%s917_s2 + $0x50] sm:$0xff] %v721_v42  ;;  %742 = vrcp.f32 %v495_v40 }
 0x141   :  { %v725_v45 = vpop.eup %724  ;;  %536 = vst [vmem:[%s917_s2] sm:$0xff] %v723_v44  ;;  %744 = vpow2.f32 %v611_v38 }
 0x142   :  { %v727_v46 = vpop.eup %726  ;;  %544 = vst [vmem:[%s917_s2 + $0x40] sm:$0xff] %v725_v45  ;;  %746 = vpow2.f32 %v601_v41 }
 0x143   :  { %v729_v47 = vpop.eup %728  ;;  %539 = vst [vmem:[%s917_s2 + $0x18] sm:$0xff] %v727_v46  ;;  %748 = vpow2.f32 %v609_v43 }
 0x144   :  { %v731_v48 = vpop.eup %730  ;;  %547 = vst [vmem:[%s917_s2 + $0x58] sm:$0xff] %v729_v47 }
 0x145   :  { %v733_v49 = vpop.eup %732  ;;  %537 = vst [vmem:[%s917_s2 + $0x8] sm:$0xff] %v731_v48 }
 0x146   :  { %v735_v50 = vpop.eup %734  ;;  %545 = vst [vmem:[%s917_s2 + $0x48] sm:$0xff] %v733_v49 }
 0x147   :  { %v737_v51 = vpop.eup %736  ;;  %542 = vst [vmem:[%s917_s2 + $0x30] sm:$0xff] %v735_v50 }
 0x148   :  { %v739_v52 = vpop.eup %738  ;;  %550 = vst [vmem:[%s917_s2 + $0x70] sm:$0xff] %v737_v51 }
 0x149   :  { %v741_v53 = vpop.eup %740  ;;  %540 = vst [vmem:[%s917_s2 + $0x20] sm:$0xff] %v739_v52 }
 0x14a   :  { %v743_v54 = vpop.eup %742  ;;  %548 = vst [vmem:[%s917_s2 + $0x60] sm:$0xff] %v741_v53 }
 0x14b   :  { %v745_v55 = vpop.eup %744  ;;  %543 = vst [vmem:[%s917_s2 + $0x38] sm:$0xff] %v743_v54 }
 0x14c   :  { %v747_v56 = vpop.eup %746  ;;  %v503_v57 = vadd.f32 1.0, %v745_v55 }
 0x14d   :  { %v749_v58 = vpop.eup %748  ;;  %v493_v59 = vadd.f32 1.0, %v747_v56 }
 0x14e   :  { %750 = vrcp.f32 %v503_v57  ;;  %v501_v60 = vadd.f32 1.0, %v749_v58 }
 0x14f   :  { %752 = vrcp.f32 %v493_v59 }
 0x150   :  { %754 = vrcp.f32 %v501_v60 }
 0x158   :  { %v751_v61 = vpop.eup %750 }
 0x159   :  { %v753_v62 = vpop.eup %752  ;;  %551 = vst [vmem:[%s917_s2 + $0x78] sm:$0xff] %v751_v61 }
 0x15a   :  { %v755_v63 = vpop.eup %754  ;;  %541 = vst [vmem:[%s917_s2 + $0x28] sm:$0xff] %v753_v62 }
 0x15b   :  { %549 = vst [vmem:[%s917_s2 + $0x68] sm:$0xff] %v755_v63 }

</bundles_post_ra>
